<compile_context>
chip_gen: v5e
topology: v5e:2x2
jax: 0.10.0
libtpu: 0.0.40
codegen_flags: <defaults>
</compile_context>

<pallas_src>
import jax
import jax.numpy as jnp
from jax.experimental import pallas as pl
from jax.experimental.pallas import tpu as pltpu

DEPTH = 7      # matches the PyTorch module default
LANE = 128
SUBLANE = 8


def _round_up(n, m):
    return ((n + m - 1) // m) * m


def _vmem_capacity_bytes():
    """Physical per-core VMEM (generation-aware: 64 MiB v7x, 128 MiB v5e/v6e)."""
    try:
        return int(pltpu.get_tpu_info().vmem_capacity_bytes)
    except Exception:
        return 64 << 20  # conservative default (v7x per-TensorCore)


# ------------------------- resident-weights kernel -------------------------

def _make_resident_kernel(depth, precision):
    def kernel(w_ref, t1_ref, obs_ref, keep_ref, o_ref):
        W = w_ref[...]              # (Np, Np) effective weights, loop-invariant
        obs = obs_ref[...]          # (Bp, Np) obs scattered onto input nodes (W dtype)
        # Hoist the (1,Np)->(Bp,Np) broadcasts out of the unrolled loop.
        keep_b = jnp.broadcast_to(keep_ref[...], obs.shape)   # W dtype
        t1_b = jnp.broadcast_to(t1_ref[...], obs.shape)       # f32 (thresholds + 1)
        x = jnp.zeros_like(obs)     # node state stays in W dtype end-to-end
        for _ in range(depth):      # small static trip count -> fully unrolled
            # x[input_ids] = obs   (obs==0 and keep==1 away from the inputs)
            x = obs + keep_b * x
            # torch.matmul(W.T, x)  ==  x_row @ W ; f32 accumulation on the MXU
            y = jnp.dot(x, W, preferred_element_type=jnp.float32,
                        precision=precision)
            # step activation: (y - thr < 1) ? 0 : 1  <=>  y >= thr + 1
            x = (y >= t1_b).astype(obs.dtype)
        o_ref[...] = x.astype(o_ref.dtype)
    return kernel


# ---------------------------- streaming kernel ------------------------------

def _make_streaming_kernel(precision):
    def kernel(w_ref, t1_ref, obs_ref, keep_ref, o_ref, x_scr, inj_scr):
        d = pl.program_id(0)        # depth step
        j = pl.program_id(1)        # column tile of W / of the new state
        tn = w_ref.shape[1]

        @pl.when(j == 0)
        def _():
            @pl.when(d == 0)
            def _():
                x_scr[...] = jnp.zeros_like(x_scr)
            # Inject observations once per depth step; later column tiles of
            # this step reuse inj_scr while x_scr is overwritten tile by tile.
            inj_scr[...] = obs_ref[...] + keep_ref[...] * x_scr[...]

        y = jnp.dot(inj_scr[...], w_ref[...],
                    preferred_element_type=jnp.float32, precision=precision)
        x_new = (y >= t1_ref[...]).astype(x_scr.dtype)
        start = pl.multiple_of(j * tn, tn)
        x_scr[:, pl.ds(start, tn)] = x_new
        # Final depth step's writeback overwrites earlier intermediates in HBM.
        o_ref[...] = x_new.astype(o_ref.dtype)
    return kernel


# ------------------------------- dispatcher ---------------------------------

def _run_graph_kernel(W_eff_pad, t1_pad, obs_pad, keep_pad, depth, precision,
                      force_streaming=False, stream_tile=None):
    Bp, Np = obs_pad.shape
    w_itemsize = jnp.dtype(W_eff_pad.dtype).itemsize
    w_bytes = Np * Np * w_itemsize
    budget = int(_vmem_capacity_bytes() * 0.85)

    # --- fast path: W_eff stays fully VMEM-resident.  grid=() is a single
    # invocation => a single W buffer (no double-buffering), so only
    # w_bytes + vectors + headroom needs to fit the per-generation budget. ---
    vec_bytes = Bp * Np * (2 * w_itemsize + 4) + 4 * Np * 4
    resident_need = w_bytes + vec_bytes + (2 << 20)
    if not force_streaming and resident_need <= budget:
        return pl.pallas_call(
            _make_resident_kernel(depth, precision),
            out_shape=jax.ShapeDtypeStruct((Bp, Np), jnp.float32),
            in_specs=[
                pl.BlockSpec((Np, Np), lambda: (0, 0)),   # W_eff (resident)
                pl.BlockSpec((1, Np), lambda: (0, 0)),    # thresholds + 1
                pl.BlockSpec((Bp, Np), lambda: (0, 0)),   # scattered observations
                pl.BlockSpec((1, Np), lambda: (0, 0)),    # keep mask
            ],
            out_specs=pl.BlockSpec((Bp, Np), lambda: (0, 0)),
            compiler_params=pltpu.CompilerParams(
                vmem_limit_bytes=min(resident_need + (8 << 20), budget)),
        )(W_eff_pad, t1_pad, obs_pad, keep_pad)

    # --- streaming fallback: grid=(depth, Np // tn).  W streamed one column
    # slab at a time (double-buffered by the pipeline); full node state and the
    # per-step injected state live in persistent VMEM scratch. ---
    fixed_bytes = (2 * Bp * Np * w_itemsize        # x_scr + inj_scr
                   + 2 * Bp * Np * w_itemsize      # obs (counted conservatively)
                   + 4 * Np * 4                    # keep + thresholds
                   + (2 << 20))                    # headroom
    candidates = ((stream_tile,) if stream_tile is not None
                  else (2048, 1024, 512, 256, 128))
    tn = None
    for cand in candidates:
        if cand is None or Np % cand:
            continue
        tile_bytes = (2 * Np * cand * w_itemsize    # double-buffered W slab
                      + 2 * Bp * cand * 4           # double-buffered out tile
                      + 2 * cand * 4)               # t1 tile
        if fixed_bytes + tile_bytes <= budget:
            tn = cand
            break
    if tn is None:
        raise ValueError(f"Graph too large for VMEM streaming: Np={Np}, Bp={Bp}")

    return pl.pallas_call(
        _make_streaming_kernel(precision),
        out_shape=jax.ShapeDtypeStruct((Bp, Np), jnp.float32),
        grid_spec=pltpu.PrefetchScalarGridSpec(
            num_scalar_prefetch=0,
            grid=(depth, Np // tn),
            in_specs=[
                pl.BlockSpec((Np, tn), lambda d, j: (0, j)),   # W column slab
                pl.BlockSpec((1, tn), lambda d, j: (0, j)),    # thresholds + 1 tile
                pl.BlockSpec((Bp, Np), lambda d, j: (0, 0)),   # observations (resident)
                pl.BlockSpec((1, Np), lambda d, j: (0, 0)),    # keep mask (resident)
            ],
            out_specs=pl.BlockSpec((Bp, tn), lambda d, j: (0, j)),
            scratch_shapes=[
                pltpu.VMEM((Bp, Np), W_eff_pad.dtype),   # node state (persistent)
                pltpu.VMEM((Bp, Np), W_eff_pad.dtype),   # injected state per depth step
            ],
        ),
        compiler_params=pltpu.CompilerParams(
            dimension_semantics=("arbitrary", "arbitrary"),
            vmem_limit_bytes=budget),
    )(W_eff_pad, t1_pad, obs_pad, keep_pad)


# ------------------------------- wrappers ------------------------------------

def _prepare_params(W, A, thresholds, input_ids, output_ids, use_bf16_weights):
    """Precompute padded, loop-invariant operands (plain XLA glue)."""
    N = W.shape[0]
    Np = max(_round_up(N, LANE), LANE)
    input_idx = jnp.asarray(input_ids, dtype=jnp.int32)
    output_idx = jnp.asarray(output_ids, dtype=jnp.int32)

    w_dtype = jnp.bfloat16 if use_bf16_weights else jnp.float32
    W_eff = jnp.abs(W.astype(jnp.float32)) * A.astype(jnp.float32)
    W_eff_pad = jnp.pad(W_eff, ((0, Np - N), (0, Np - N))).astype(w_dtype)

    # thresholds + 1 hoisted out of the kernel loop; padded entries huge so
    # phantom nodes never activate.
    t1 = thresholds.astype(jnp.float32) + 1.0
    t1_pad = jnp.pad(t1, (0, Np - N), constant_values=1e9).reshape(1, Np)

    # keep mask: 0 at input nodes, 1 elsewhere; shipped in the weight dtype so
    # the whole depth loop stays in one dtype.
    keep_pad = jnp.ones((1, Np), w_dtype).at[0, input_idx].set(0)

    # f32 escape hatch uses HIGHEST (bit-faithful); costs 3-6x MXU passes, so
    # prefer the default bf16 path unless weights are not bf16-representable.
    precision = None if use_bf16_weights else jax.lax.Precision.HIGHEST
    return Np, input_idx, output_idx, W_eff_pad, t1_pad, keep_pad, precision


def nn_from_graph_forward_batched(W, A, thresholds, obs_batch, input_ids, output_ids,
                                  depth=DEPTH, use_bf16_weights=True,
                                  force_streaming=False, stream_tile=None):
    """Evaluate a (B, n_inputs) batch of observations in one kernel call."""
    if len(input_ids) < obs_batch.shape[-1]:
        raise ValueError("The observation is larger than the input")
    (Np, input_idx, output_idx, W_eff_pad, t1_pad, keep_pad,
     precision) = _prepare_params(W, A, thresholds, input_ids, output_ids,
                                  use_bf16_weights)

    B = obs_batch.shape[0]
    # bf16 state: pad the batch to a multiple of 16 sublanes (full vreg packing);
    # f32: multiple of 8.  Batch observations to fill the MXU M dimension.
    sub = 16 if use_bf16_weights else SUBLANE
    Bp = max(_round_up(B, sub), sub)
    obs_pad = jnp.zeros((Bp, Np), W_eff_pad.dtype)
    obs_pad = obs_pad.at[:B, input_idx].set(obs_batch.astype(W_eff_pad.dtype))

    x = _run_graph_kernel(W_eff_pad, t1_pad, obs_pad, keep_pad, depth, precision,
                          force_streaming=force_streaming, stream_tile=stream_tile)
    return x[:B, output_idx].astype(jnp.int32)


def nn_from_graph_forward(W, A, thresholds, obs, input_ids, output_ids,
                          depth=DEPTH, use_bf16_weights=True):
    """Single-observation forward, matching NNFromGraph.forward semantics."""
    if len(input_ids) < obs.shape[0]:
        raise ValueError("The observation is larger than the input")
    out = nn_from_graph_forward_batched(W, A, thresholds, obs[None, :],
                                        input_ids, output_ids,
                                        depth=depth,
                                        use_bf16_weights=use_bf16_weights)
    return out[0]


def _reference_forward(W, A, thresholds, obs, input_ids, output_ids, depth=DEPTH):
    """Pure-JAX reference mirroring the PyTorch loop, for sanity checks."""
    Weff = jnp.abs(W.astype(jnp.float32)) * A.astype(jnp.float32)
    x = jnp.zeros((W.shape[0],), jnp.float32)
    for _ in range(depth):
        x = x.at[jnp.asarray(input_ids)].set(obs.astype(jnp.float32))
        x = jnp.where(Weff.T @ x - thresholds < 1.0, 0.0, 1.0)
    return x[jnp.asarray(output_ids)].astype(jnp.int32)


if __name__ == "__main__":
    key = jax.random.PRNGKey(0)

    # --- small graph: resident-weights fast path ---
    N = 32
    input_ids = [0, 1]
    output_ids = [N - 1]
    k_adj, k_thr, k_obs = jax.random.split(key, 3)
    A = jax.random.bernoulli(k_adj, p=0.35, shape=(N, N)).astype(jnp.float32)
    A = A * (1.0 - jnp.eye(N, dtype=jnp.float32))     # binary adjacency, no self-loops
    W = A                                             # nn.Parameter clone of A
    thresholds = jax.random.randint(k_thr, (N,), 0, 3).astype(jnp.float32)
    obs = jax.random.bernoulli(k_obs, p=0.5, shape=(2,)).astype(jnp.float32)

    out = jax.block_until_ready(
        nn_from_graph_forward(W, A, thresholds, obs, input_ids, output_ids))
    ref = _reference_forward(W, A, thresholds, obs, input_ids, output_ids)
    assert out.shape == ref.shape and out.dtype == jnp.int32
    assert bool(jnp.all(out == ref))

    # f32 escape-hatch path
    out32 = jax.block_until_ready(
        nn_from_graph_forward(W, A, thresholds, obs, input_ids, output_ids,
                              use_bf16_weights=False))
    assert bool(jnp.all(out32 == ref))

    # batched resident path (4 observations, one kernel call)
    obs_b = jax.random.bernoulli(jax.random.PRNGKey(1), p=0.5,
                                 shape=(4, 2)).astype(jnp.float32)
    out_b = jax.block_until_ready(
        nn_from_graph_forward_batched(W, A, thresholds, obs_b, input_ids, output_ids))
    for b in range(4):
        assert bool(jnp.all(out_b[b] == _reference_forward(
            W, A, thresholds, obs_b[b], input_ids, output_ids)))

    # --- larger graph: forced streaming fallback (128-wide W column slabs,
    # grid=(7, 2)), exercising the persistent-scratch depth loop ---
    N2 = 200
    input_ids2 = [0, 1, 2]
    output_ids2 = [N2 - 2, N2 - 1]
    k2a, k2t, k2o = jax.random.split(jax.random.PRNGKey(2), 3)
    A2 = jax.random.bernoulli(k2a, p=0.05, shape=(N2, N2)).astype(jnp.float32)
    A2 = A2 * (1.0 - jnp.eye(N2, dtype=jnp.float32))
    W2 = A2
    thr2 = jax.random.randint(k2t, (N2,), 0, 3).astype(jnp.float32)
    obs2 = jax.random.bernoulli(k2o, p=0.5, shape=(4, 3)).astype(jnp.float32)
    out2 = jax.block_until_ready(
        nn_from_graph_forward_batched(W2, A2, thr2, obs2, input_ids2, output_ids2,
                                      force_streaming=True, stream_tile=128))
    for b in range(4):
        assert bool(jnp.all(out2[b] == _reference_forward(
            W2, A2, thr2, obs2[b], input_ids2, output_ids2)))

    print("KERNEL_OK")
</pallas_src>

<mosaic_0001>
module attributes {stable_mosaic.version = 11 : i64} {
  func.func @kernel(%arg0: memref<128x128xbf16, #tpu.memory_space<vmem>>, %arg1: memref<1x128xf32, #tpu.memory_space<vmem>>, %arg2: memref<16x128xbf16, #tpu.memory_space<vmem>>, %arg3: memref<1x128xbf16, #tpu.memory_space<vmem>>, %arg4: memref<16x128xf32, #tpu.memory_space<vmem>>) attributes {dimension_semantics = [], scalar_prefetch = 0 : i64, scratch_operands = 0 : i64, tpu.core_type = #tpu.core_type<tc>} {
    %c0 = arith.constant 0 : index
    %c0_0 = arith.constant 0 : index
    %0 = vector.load %arg0[%c0, %c0_0] : memref<128x128xbf16, #tpu.memory_space<vmem>>, vector<128x128xbf16>
    %c0_1 = arith.constant 0 : index
    %c0_2 = arith.constant 0 : index
    %1 = vector.load %arg2[%c0_1, %c0_2] : memref<16x128xbf16, #tpu.memory_space<vmem>>, vector<16x128xbf16>
    %c0_3 = arith.constant 0 : index
    %c0_4 = arith.constant 0 : index
    %2 = vector.load %arg3[%c0_3, %c0_4] : memref<1x128xbf16, #tpu.memory_space<vmem>>, vector<1x128xbf16>
    %3 = vector.shape_cast %2 : vector<1x128xbf16> to vector<1x128xbf16>
    %4 = vector.broadcast %3 : vector<1x128xbf16> to vector<16x128xbf16>
    %c0_5 = arith.constant 0 : index
    %c0_6 = arith.constant 0 : index
    %5 = vector.load %arg1[%c0_5, %c0_6] : memref<1x128xf32, #tpu.memory_space<vmem>>, vector<1x128xf32>
    %6 = vector.shape_cast %5 : vector<1x128xf32> to vector<1x128xf32>
    %7 = vector.broadcast %6 : vector<1x128xf32> to vector<16x128xf32>
    %cst = arith.constant 0.000000e+00 : bf16
    %8 = vector.broadcast %cst : bf16 to vector<16x128xbf16>
    %9 = arith.mulf %4, %8 : vector<16x128xbf16>
    %10 = arith.addf %1, %9 : vector<16x128xbf16>
    %cst_7 = arith.constant dense<0.000000e+00> : vector<16x128xf32>
    %11 = tpu.matmul %10, %0, %cst_7 {dimension_numbers = #tpu.dot_dimension_numbers<[1], [0], [0], [1], [0, 0, 1, 1], [], []>} : vector<16x128xbf16>, vector<128x128xbf16>, vector<16x128xf32> -> vector<16x128xf32>
    %12 = arith.cmpf oge, %11, %7 : vector<16x128xf32>
    %13 = arith.extui %12 : vector<16x128xi1> to vector<16x128xi32>
    %14 = arith.sitofp %13 : vector<16x128xi32> to vector<16x128xf32>
    %15 = arith.truncf %14 : vector<16x128xf32> to vector<16x128xbf16>
    %16 = arith.mulf %4, %15 : vector<16x128xbf16>
    %17 = arith.addf %1, %16 : vector<16x128xbf16>
    %cst_8 = arith.constant dense<0.000000e+00> : vector<16x128xf32>
    %18 = tpu.matmul %17, %0, %cst_8 {dimension_numbers = #tpu.dot_dimension_numbers<[1], [0], [0], [1], [0, 0, 1, 1], [], []>} : vector<16x128xbf16>, vector<128x128xbf16>, vector<16x128xf32> -> vector<16x128xf32>
    %19 = arith.cmpf oge, %18, %7 : vector<16x128xf32>
    %20 = arith.extui %19 : vector<16x128xi1> to vector<16x128xi32>
    %21 = arith.sitofp %20 : vector<16x128xi32> to vector<16x128xf32>
    %22 = arith.truncf %21 : vector<16x128xf32> to vector<16x128xbf16>
    %23 = arith.mulf %4, %22 : vector<16x128xbf16>
    %24 = arith.addf %1, %23 : vector<16x128xbf16>
    %cst_9 = arith.constant dense<0.000000e+00> : vector<16x128xf32>
    %25 = tpu.matmul %24, %0, %cst_9 {dimension_numbers = #tpu.dot_dimension_numbers<[1], [0], [0], [1], [0, 0, 1, 1], [], []>} : vector<16x128xbf16>, vector<128x128xbf16>, vector<16x128xf32> -> vector<16x128xf32>
    %26 = arith.cmpf oge, %25, %7 : vector<16x128xf32>
    %27 = arith.extui %26 : vector<16x128xi1> to vector<16x128xi32>
    %28 = arith.sitofp %27 : vector<16x128xi32> to vector<16x128xf32>
    %29 = arith.truncf %28 : vector<16x128xf32> to vector<16x128xbf16>
    %30 = arith.mulf %4, %29 : vector<16x128xbf16>
    %31 = arith.addf %1, %30 : vector<16x128xbf16>
    %cst_10 = arith.constant dense<0.000000e+00> : vector<16x128xf32>
    %32 = tpu.matmul %31, %0, %cst_10 {dimension_numbers = #tpu.dot_dimension_numbers<[1], [0], [0], [1], [0, 0, 1, 1], [], []>} : vector<16x128xbf16>, vector<128x128xbf16>, vector<16x128xf32> -> vector<16x128xf32>
    %33 = arith.cmpf oge, %32, %7 : vector<16x128xf32>
    %34 = arith.extui %33 : vector<16x128xi1> to vector<16x128xi32>
    %35 = arith.sitofp %34 : vector<16x128xi32> to vector<16x128xf32>
    %36 = arith.truncf %35 : vector<16x128xf32> to vector<16x128xbf16>
    %37 = arith.mulf %4, %36 : vector<16x128xbf16>
    %38 = arith.addf %1, %37 : vector<16x128xbf16>
    %cst_11 = arith.constant dense<0.000000e+00> : vector<16x128xf32>
    %39 = tpu.matmul %38, %0, %cst_11 {dimension_numbers = #tpu.dot_dimension_numbers<[1], [0], [0], [1], [0, 0, 1, 1], [], []>} : vector<16x128xbf16>, vector<128x128xbf16>, vector<16x128xf32> -> vector<16x128xf32>
    %40 = arith.cmpf oge, %39, %7 : vector<16x128xf32>
    %41 = arith.extui %40 : vector<16x128xi1> to vector<16x128xi32>
    %42 = arith.sitofp %41 : vector<16x128xi32> to vector<16x128xf32>
    %43 = arith.truncf %42 : vector<16x128xf32> to vector<16x128xbf16>
    %44 = arith.mulf %4, %43 : vector<16x128xbf16>
    %45 = arith.addf %1, %44 : vector<16x128xbf16>
    %cst_12 = arith.constant dense<0.000000e+00> : vector<16x128xf32>
    %46 = tpu.matmul %45, %0, %cst_12 {dimension_numbers = #tpu.dot_dimension_numbers<[1], [0], [0], [1], [0, 0, 1, 1], [], []>} : vector<16x128xbf16>, vector<128x128xbf16>, vector<16x128xf32> -> vector<16x128xf32>
    %47 = arith.cmpf oge, %46, %7 : vector<16x128xf32>
    %48 = arith.extui %47 : vector<16x128xi1> to vector<16x128xi32>
    %49 = arith.sitofp %48 : vector<16x128xi32> to vector<16x128xf32>
    %50 = arith.truncf %49 : vector<16x128xf32> to vector<16x128xbf16>
    %51 = arith.mulf %4, %50 : vector<16x128xbf16>
    %52 = arith.addf %1, %51 : vector<16x128xbf16>
    %cst_13 = arith.constant dense<0.000000e+00> : vector<16x128xf32>
    %53 = tpu.matmul %52, %0, %cst_13 {dimension_numbers = #tpu.dot_dimension_numbers<[1], [0], [0], [1], [0, 0, 1, 1], [], []>} : vector<16x128xbf16>, vector<128x128xbf16>, vector<16x128xf32> -> vector<16x128xf32>
    %54 = arith.cmpf oge, %53, %7 : vector<16x128xf32>
    %55 = arith.extui %54 : vector<16x128xi1> to vector<16x128xi32>
    %56 = arith.sitofp %55 : vector<16x128xi32> to vector<16x128xf32>
    %57 = arith.truncf %56 : vector<16x128xf32> to vector<16x128xbf16>
    %58 = arith.extf %57 : vector<16x128xbf16> to vector<16x128xf32>
    %c0_14 = arith.constant 0 : index
    %c0_15 = arith.constant 0 : index
    %59 = vector.load %arg4[%c0_14, %c0_15] : memref<16x128xf32, #tpu.memory_space<vmem>>, vector<16x128xf32>
    tpu.vector_store %arg4[%c0_14, %c0_15], %58 {strides = array<i32>} : memref<16x128xf32, #tpu.memory_space<vmem>>, vector<16x128xf32>,
    return
  }
}

</mosaic_0001>

<bundles_post_ra>
// kernel: tpu_custom_call.1
= control target key start
LH: loop header
LB: loop body
LE: loop exit
PB: predicated region body
PF: predicated region fallthrough
CT: control target
= control target key end

     0   :  { %9 = vsyncpa [#allocation3], 0  ;;  %s673_s0 = inlined_call_operand.hbm [shape: bf16[128,128], index: 0, kind: input, shape index: {}]   ;;  %s674_s1 = inlined_call_operand.hbm [shape: f32[1,128], index: 1, kind: input, shape index: {}]   ;;  %s675_s2 = inlined_call_operand.hbm [shape: bf16[16,128], index: 2, kind: input, shape index: {}]   ;;  %s676_s3 = inlined_call_operand.vmem [shape: bf16[1,128], index: 3, kind: input, shape index: {}]   ;;  %s677_s4 = inlined_call_operand.hbm [shape: f32[16,128], index: 4, kind: output, shape index: {}]  }
   0x1   :  { %10 = vsyncpa [#allocation6], 0  ;;  %s30_s17 = sshll.u32 %s674_s1, 4  ;;  %s31_s17 = int_to_ptr.hbm [resolvable:$true] %s30_s17 }
   0x2   :  { %11 = vsyncpa [#allocation4], 0  ;;  %s561_s18 = smov [#allocation5]   ;;  %s16_s22 = sshll.u32 %s673_s0, 4  ;;  %s17_s22 = int_to_ptr.hbm [resolvable:$true] %s16_s22 }
   0x3   :  { %s32_s19 = sshll.u32 %s561_s18, 4  ;;  %s562_s23 = smov [#allocation2]   ;;  %s33_s19 = int_to_ptr.vmem [resolvable:$true] %s32_s19 }
   0x4   :  { %35 = dma.hbm_to_vmem [thread:$0]  %s31_s17, 16, %s33_s19, [#allocation6]  }
   0x5   :  { %s18_s24 = sshll.u32 %s562_s23, 4  ;;  %s563_s25 = smov 64   ;;  %s19_s24 = int_to_ptr.vmem [resolvable:$true] %s18_s24 }
   0x6   :  { %s564_s26 = smov 4   ;;  %s40_s1 = sshll.u32 %s675_s2, 4  ;;  %s41_s1 = int_to_ptr.hbm [resolvable:$true] %s40_s1 }
   0x7   :  { %24 = dma.hbm_to_vmem [thread:$0]  %s17_s22, 1024, %s19_s24, [#allocation3], %s563_s25, %s563_s25, %s564_s26  }
   0x8   :  { %s565_s29 = smov [#allocation7]  }
   0x9   :  { %s42_s30 = sshll.u32 %s565_s29, 4  ;;  %s43_s30 = int_to_ptr.vmem [resolvable:$true] %s42_s30 }
   0xa   :  { %48 = dma.hbm_to_vmem [thread:$0]  %s41_s1, 128, %s43_s30, [#allocation6], %s563_s25, %s563_s25, %s564_s26  }
   0xb   :  { %555 = dma.done.wait [#allocation3], 1024  }
   0xc   :  { %556 = vsyncadd [#allocation3], 4294966272 }
   0xd   :  { %557 = dma.done.wait [#allocation6], 144  }
   0xe   :  { %558 = vsyncadd [#allocation6], 4294967152  ;;  %v444_v0 = vld [vmem:[#allocation2 + $0x38] sm:$0xff]  ;;  %v443_v1 = vld [vmem:[#allocation2 + $0x30] sm:$0xff]  ;;  %v566_v23 = vmov 0.0   ;;  %s567_s2 = smov [#allocation8]  }
   0xf   :  { %147 = vmatpush.bf16.msra.mxu0 %v444_v0  ;;  %180 = vmatpush.bf16.msra.mxu1 %v444_v0  ;;  %v81_v2 = vld [vmem:[%s676_s3] sm:$0x1]  ;;  %v442_v4 = vld [vmem:[#allocation2 + $0x28] sm:$0xff]  ;;  %v440_v9 = vld [vmem:[#allocation2 + $0x18] sm:$0xff]  ;;  %s375_s3 = sshll.u32 %s567_s2, 4  ;;  %s377_s8 = sshll.u32 %s677_s4, 4  ;;  %s376_s3 = int_to_ptr.vmem [resolvable:$true] %s375_s3  ;;  %s378_s8 = int_to_ptr.hbm [resolvable:$true] %s377_s8 }
  0x10   :  { %213 = vmatpush.bf16.msra.mxu2 %v444_v0  ;;  %246 = vmatpush.bf16.msra.mxu3 %v444_v0  ;;  %v83_v3 = vpack.i.b16 %v81_v2, %v81_v2  ;;  %v441_v7 = vld [vmem:[#allocation2 + $0x20] sm:$0xff]  ;;  %v439_v11 = vld [vmem:[#allocation2 + $0x10] sm:$0xff]  ;;  %v438_v16 = vld [vmem:[#allocation2 + $0x8] sm:$0xff]  ;;  %s568_s9 = smov 128   ;;  %s569_s10 = smov 8  }
  0x11   :  { %v446_v12 = vld [vmem:[#allocation7] sm:$0xff]   ;;  %v616_v21 = vld [vmem:[#allocation5] ss:$0 sm:$0xff] }
  0x12   :  { %v85_v5 = vperm.slane %v83_v3, 0  ;;  %v610_v13 = vunpack.c.l.bf16 %v446_v12  ;;  %v612_v14 = vunpack.c.h.bf16 %v446_v12  ;;  %v437_v19 = vld [vmem:[#allocation2] sm:$0xff] }
  0x13   :  { %148 = vmatpush.bf16.msra.mxu0 %v443_v1  ;;  %181 = vmatpush.bf16.msra.mxu1 %v443_v1 }
  0x14   :  { %214 = vmatpush.bf16.msra.mxu2 %v443_v1  ;;  %247 = vmatpush.bf16.msra.mxu3 %v443_v1  ;;  %v607_v6 = vunpack.c.l.bf16 %v85_v5 }
  0x16   :  { %v91_v8 = vmul.f32 0.0, %v607_v6 }
  0x17   :  { %149 = vmatpush.bf16.msra.mxu0 %v442_v4  ;;  %182 = vmatpush.bf16.msra.mxu1 %v442_v4 }
  0x18   :  { %215 = vmatpush.bf16.msra.mxu2 %v442_v4  ;;  %248 = vmatpush.bf16.msra.mxu3 %v442_v4  ;;  %v92_v10 = vpack.c.bf16 %v91_v8, %v91_v8 }
  0x1a   :  { %v95_v15 = vunpack.c.l.bf16 %v92_v10 }
  0x1b   :  { %150 = vmatpush.bf16.msra.mxu0 %v441_v7  ;;  %183 = vmatpush.bf16.msra.mxu1 %v441_v7 }
  0x1c   :  { %216 = vmatpush.bf16.msra.mxu2 %v441_v7  ;;  %249 = vmatpush.bf16.msra.mxu3 %v441_v7  ;;  %v96_v17 = vadd.f32 %v610_v13, %v95_v15  ;;  %v97_v18 = vadd.f32 %v612_v14, %v95_v15 }
  0x1e   :  { %v98_v20 = vpack.c.bf16 %v97_v18, %v96_v17 }
  0x1f   :  { %151 = vmatpush.bf16.msra.mxu0 %v440_v9  ;;  %184 = vmatpush.bf16.msra.mxu1 %v440_v9 }
  0x20   :  { %217 = vmatpush.bf16.msra.mxu2 %v440_v9  ;;  %250 = vmatpush.bf16.msra.mxu3 %v440_v9 }
  0x23   :  { %152 = vmatpush.bf16.msra.mxu0 %v439_v11  ;;  %185 = vmatpush.bf16.msra.mxu1 %v439_v11 }
  0x24   :  { %218 = vmatpush.bf16.msra.mxu2 %v439_v11  ;;  %251 = vmatpush.bf16.msra.mxu3 %v439_v11 }
  0x27   :  { %153 = vmatpush.bf16.msra.mxu0 %v438_v16  ;;  %186 = vmatpush.bf16.msra.mxu1 %v438_v16 }
  0x28   :  { %219 = vmatpush.bf16.msra.mxu2 %v438_v16  ;;  %252 = vmatpush.bf16.msra.mxu3 %v438_v16 }
  0x2b   :  { %154 = vmatpush.bf16.msra.mxu0 %v437_v19  ;;  %187 = vmatpush.bf16.msra.mxu1 %v437_v19 }
  0x2c   :  { %220 = vmatpush.bf16.msra.mxu2 %v437_v19  ;;  %253 = vmatpush.bf16.msra.mxu3 %v437_v19 }
  0x2e   :  { %155 = vmatmul.bf16.vlgmr.msra.gmra.mxu0 %v98_v20 }
  0x2f   :  { %279 = vmatpush.bf16.msrb.mxu0 %v444_v0  ;;  %312 = vmatpush.bf16.msrb.mxu1 %v444_v0 }
  0x30   :  { %345 = vmatpush.bf16.msrb.mxu2 %v444_v0 }
  0x33   :  { %280 = vmatpush.bf16.msrb.mxu0 %v443_v1  ;;  %313 = vmatpush.bf16.msrb.mxu1 %v443_v1 }
  0x34   :  { %346 = vmatpush.bf16.msrb.mxu2 %v443_v1 }
  0x37   :  { %281 = vmatpush.bf16.msrb.mxu0 %v442_v4  ;;  %314 = vmatpush.bf16.msrb.mxu1 %v442_v4 }
  0x38   :  { %347 = vmatpush.bf16.msrb.mxu2 %v442_v4 }
  0x3b   :  { %282 = vmatpush.bf16.msrb.mxu0 %v441_v7  ;;  %315 = vmatpush.bf16.msrb.mxu1 %v441_v7 }
  0x3c   :  { %348 = vmatpush.bf16.msrb.mxu2 %v441_v7 }
  0x3f   :  { %283 = vmatpush.bf16.msrb.mxu0 %v440_v9  ;;  %316 = vmatpush.bf16.msrb.mxu1 %v440_v9 }
  0x40   :  { %349 = vmatpush.bf16.msrb.mxu2 %v440_v9 }
  0x43   :  { %284 = vmatpush.bf16.msrb.mxu0 %v439_v11  ;;  %317 = vmatpush.bf16.msrb.mxu1 %v439_v11 }
  0x44   :  { %350 = vmatpush.bf16.msrb.mxu2 %v439_v11 }
  0x47   :  { %285 = vmatpush.bf16.msrb.mxu0 %v438_v16  ;;  %318 = vmatpush.bf16.msrb.mxu1 %v438_v16 }
  0x48   :  { %351 = vmatpush.bf16.msrb.mxu2 %v438_v16 }
  0x4b   :  { %286 = vmatpush.bf16.msrb.mxu0 %v437_v19  ;;  %319 = vmatpush.bf16.msrb.mxu1 %v437_v19 }
  0x4c   :  { %352 = vmatpush.bf16.msrb.mxu2 %v437_v19 }
  0xab   :  { %v156_v22 = vpop.f32.mrf.mxu0 }
  0xac   :  { %vm161_vm0 = vcmp.ge.f32.partialorder %v156_v22, %v616_v21 }
  0xad   :  { %v423_v24 = vsel %vm161_vm0, 1.0, %v566_v23 }
  0xae   :  { %v171_v25 = vmul.f32 %v423_v24, %v607_v6 }
  0xb0   :  { %v173_v27 = vpack.c.bf16 %v171_v25, %v171_v25 }
  0xb2   :  { %v175_v30 = vunpack.c.l.bf16 %v173_v27 }
  0xb3   :  { %v158_v26 = vpop.f32.mrf.mxu0 }
  0xb4   :  { %vm162_vm1 = vcmp.ge.f32.partialorder %v158_v26, %v616_v21  ;;  %v177_v33 = vadd.f32 %v610_v13, %v175_v30 }
  0xb5   :  { %v424_v28 = vsel %vm162_vm1, 1.0, %v566_v23 }
  0xb6   :  { %v172_v29 = vmul.f32 %v424_v28, %v607_v6 }
  0xb8   :  { %v174_v31 = vpack.c.bf16 %v172_v29, %v172_v29 }
  0xba   :  { %v176_v32 = vunpack.c.l.bf16 %v174_v31 }
  0xbc   :  { %v178_v34 = vadd.f32 %v612_v14, %v176_v32 }
  0xbe   :  { %v179_v35 = vpack.c.bf16 %v178_v34, %v177_v33 }
  0xc0   :  { %188 = vmatmul.bf16.vlgmr.msra.gmra.mxu1 %v179_v35 }
 0x13d   :  { %v189_v36 = vpop.f32.mrf.mxu1 }
 0x13e   :  { %vm194_vm2 = vcmp.ge.f32.partialorder %v189_v36, %v616_v21 }
 0x13f   :  { %v425_v37 = vsel %vm194_vm2, 1.0, %v566_v23 }
 0x140   :  { %v204_v38 = vmul.f32 %v425_v37, %v607_v6 }
 0x142   :  { %v206_v40 = vpack.c.bf16 %v204_v38, %v204_v38 }
 0x144   :  { %v208_v43 = vunpack.c.l.bf16 %v206_v40 }
 0x145   :  { %v191_v39 = vpop.f32.mrf.mxu1 }
 0x146   :  { %vm195_vm3 = vcmp.ge.f32.partialorder %v191_v39, %v616_v21  ;;  %v210_v46 = vadd.f32 %v610_v13, %v208_v43 }
 0x147   :  { %v426_v41 = vsel %vm195_vm3, 1.0, %v566_v23 }
 0x148   :  { %v205_v42 = vmul.f32 %v426_v41, %v607_v6 }
 0x14a   :  { %v207_v44 = vpack.c.bf16 %v205_v42, %v205_v42 }
 0x14c   :  { %v209_v45 = vunpack.c.l.bf16 %v207_v44 }
 0x14e   :  { %v211_v47 = vadd.f32 %v612_v14, %v209_v45 }
 0x150   :  { %v212_v48 = vpack.c.bf16 %v211_v47, %v210_v46 }
 0x152   :  { %221 = vmatmul.bf16.vlgmr.msra.gmra.mxu2 %v212_v48 }
 0x1d5   :  { %v222_v49 = vpop.f32.mrf.mxu2 }
 0x1d6   :  { %vm227_vm4 = vcmp.ge.f32.partialorder %v222_v49, %v616_v21 }
 0x1d7   :  { %v427_v50 = vsel %vm227_vm4, 1.0, %v566_v23 }
 0x1d8   :  { %v237_v51 = vmul.f32 %v427_v50, %v607_v6 }
 0x1da   :  { %v239_v53 = vpack.c.bf16 %v237_v51, %v237_v51 }
 0x1dc   :  { %v241_v56 = vunpack.c.l.bf16 %v239_v53 }
 0x1dd   :  { %v224_v52 = vpop.f32.mrf.mxu2 }
 0x1de   :  { %vm228_vm5 = vcmp.ge.f32.partialorder %v224_v52, %v616_v21  ;;  %v243_v59 = vadd.f32 %v610_v13, %v241_v56 }
 0x1df   :  { %v428_v54 = vsel %vm228_vm5, 1.0, %v566_v23 }
 0x1e0   :  { %v238_v55 = vmul.f32 %v428_v54, %v607_v6 }
 0x1e2   :  { %v240_v57 = vpack.c.bf16 %v238_v55, %v238_v55 }
 0x1e4   :  { %v242_v58 = vunpack.c.l.bf16 %v240_v57 }
 0x1e6   :  { %v244_v60 = vadd.f32 %v612_v14, %v242_v58 }
 0x1e8   :  { %v245_v61 = vpack.c.bf16 %v244_v60, %v243_v59 }
 0x1ea   :  { %254 = vmatmul.bf16.vlgmr.msra.gmra.mxu3 %v245_v61 }
 0x26d   :  { %v255_v62 = vpop.f32.mrf.mxu3 }
 0x26e   :  { %vm260_vm6 = vcmp.ge.f32.partialorder %v255_v62, %v616_v21 }
 0x26f   :  { %v429_v63 = vsel %vm260_vm6, 1.0, %v566_v23 }
 0x270   :  { %v270_v0 = vmul.f32 %v429_v63, %v607_v6 }
 0x272   :  { %v272_v2 = vpack.c.bf16 %v270_v0, %v270_v0 }
 0x274   :  { %v274_v5 = vunpack.c.l.bf16 %v272_v2 }
 0x275   :  { %v257_v1 = vpop.f32.mrf.mxu3 }
 0x276   :  { %vm261_vm7 = vcmp.ge.f32.partialorder %v257_v1, %v616_v21  ;;  %v276_v9 = vadd.f32 %v610_v13, %v274_v5 }
 0x277   :  { %v430_v3 = vsel %vm261_vm7, 1.0, %v566_v23 }
 0x278   :  { %v271_v4 = vmul.f32 %v430_v3, %v607_v6 }
 0x27a   :  { %v273_v7 = vpack.c.bf16 %v271_v4, %v271_v4 }
 0x27c   :  { %v275_v8 = vunpack.c.l.bf16 %v273_v7 }
 0x27e   :  { %v277_v10 = vadd.f32 %v612_v14, %v275_v8 }
 0x280   :  { %v278_v11 = vpack.c.bf16 %v277_v10, %v276_v9 }
 0x282   :  { %287 = vmatmul.bf16.vlgmr.msrb.gmra.mxu0 %v278_v11 }
 0x2ff   :  { %v288_v12 = vpop.f32.mrf.mxu0 }
 0x300   :  { %vm293_vm8 = vcmp.ge.f32.partialorder %v288_v12, %v616_v21 }
 0x301   :  { %v431_v15 = vsel %vm293_vm8, 1.0, %v566_v23 }
 0x302   :  { %v303_v16 = vmul.f32 %v431_v15, %v607_v6 }
 0x304   :  { %v305_v18 = vpack.c.bf16 %v303_v16, %v303_v16 }
 0x306   :  { %v307_v22 = vunpack.c.l.bf16 %v305_v18 }
 0x307   :  { %v290_v17 = vpop.f32.mrf.mxu0 }
 0x308   :  { %vm294_vm9 = vcmp.ge.f32.partialorder %v290_v17, %v616_v21  ;;  %v309_v26 = vadd.f32 %v610_v13, %v307_v22 }
 0x309   :  { %v432_v19 = vsel %vm294_vm9, 1.0, %v566_v23 }
 0x30a   :  { %v304_v20 = vmul.f32 %v432_v19, %v607_v6 }
 0x30c   :  { %v306_v24 = vpack.c.bf16 %v304_v20, %v304_v20 }
 0x30e   :  { %v308_v25 = vunpack.c.l.bf16 %v306_v24 }
 0x310   :  { %v310_v27 = vadd.f32 %v612_v14, %v308_v25 }
 0x312   :  { %v311_v28 = vpack.c.bf16 %v310_v27, %v309_v26 }
 0x314   :  { %320 = vmatmul.bf16.vlgmr.msrb.gmra.mxu1 %v311_v28 }
 0x391   :  { %v321_v29 = vpop.f32.mrf.mxu1 }
 0x392   :  { %vm326_vm10 = vcmp.ge.f32.partialorder %v321_v29, %v616_v21 }
 0x393   :  { %v433_v30 = vsel %vm326_vm10, 1.0, %v566_v23 }
 0x394   :  { %v336_v31 = vmul.f32 %v433_v30, %v607_v6 }
 0x396   :  { %v338_v33 = vpack.c.bf16 %v336_v31, %v336_v31 }
 0x398   :  { %v340_v36 = vunpack.c.l.bf16 %v338_v33 }
 0x399   :  { %v323_v32 = vpop.f32.mrf.mxu1 }
 0x39a   :  { %vm327_vm11 = vcmp.ge.f32.partialorder %v323_v32, %v616_v21  ;;  %v342_v39 = vadd.f32 %v610_v13, %v340_v36 }
 0x39b   :  { %v434_v34 = vsel %vm327_vm11, 1.0, %v566_v23 }
 0x39c   :  { %v337_v35 = vmul.f32 %v434_v34, %v607_v6 }
 0x39e   :  { %v339_v37 = vpack.c.bf16 %v337_v35, %v337_v35 }
 0x3a0   :  { %v341_v38 = vunpack.c.l.bf16 %v339_v37 }
 0x3a2   :  { %v343_v40 = vadd.f32 %v612_v14, %v341_v38 }
 0x3a4   :  { %v344_v41 = vpack.c.bf16 %v343_v40, %v342_v39 }
 0x3a6   :  { %353 = vmatmul.bf16.vlgmr.msrb.gmra.mxu2 %v344_v41 }
 0x429   :  { %v354_v42 = vpop.f32.mrf.mxu2 }
 0x42a   :  { %vm359_vm12 = vcmp.ge.f32.partialorder %v354_v42, %v616_v21 }
 0x42b   :  { %v435_v43 = vsel %vm359_vm12, 1.0, %v566_v23 }
 0x42c   :  { %369 = vst [vmem:[#allocation8] sm:$0xff] %v435_v43 }
 0x431   :  { %v356_v6 = vpop.f32.mrf.mxu2 }
 0x432   :  { %vm360_vm13 = vcmp.ge.f32.partialorder %v356_v6, %v616_v21 }
 0x433   :  { %v436_v13 = vsel %vm360_vm13, 1.0, %v566_v23 }
 0x434   :  { %370 = vst [vmem:[#allocation8 + $0x8] sm:$0xff] %v436_v13 }
 0x435   :  { %383 = dma.vmem_to_hbm [thread:$0]  %s376_s3, 256, %s378_s8, [#allocation4], %s568_s9, %s568_s9, %s569_s10  }
 0x436   :  { %559 = dma.done.wait [#allocation4], 256  }
 0x437   :  { %560 = vsyncadd [#allocation4], 4294967040 }
 0x438   :  { %388 = vsyncpa [#allocation3], 1 }
 0x439   :  { %389 = vsyncpa [#allocation6], 1 }
 0x43a   :  { %390 = vsyncpa [#allocation4], 1 }

</bundles_post_ra>
